<compile_context>
chip_gen: v7x
topology: tpu7x:2x2x1
jax: 0.10.0
libtpu: 0.0.40
codegen_flags: <defaults>
</compile_context>

<pallas_src>
import jax
import jax.numpy as jnp
from jax.experimental import pallas as pl
from jax.experimental.pallas import tpu as pltpu

EPS = 1e-5


# ---------------------------------------------------------------------------
# Pallas kernel: fused 3x3/s2 conv + folded BN + ReLU for one (image, row-tile)
# ---------------------------------------------------------------------------
def _stem_conv_bn_relu_kernel(xe_ref, xeh_ref, xo_ref, xoh_ref,
                              w_ref, s_ref, b_ref, o_ref):
    """Refs (per grid step (n, r)):
      xe_ref : (1, 2*TH, Wo+1, Cin)  even padded columns, padded rows [2*TH*r, 2*TH*(r+1))
      xeh_ref: (1, 2,    Wo+1, Cin)  even columns, 1-row halo at padded row 2*TH*(r+1)
      xo_ref : (1, 2*TH, Wo+1, Cin)  odd padded columns, same rows
      xoh_ref: (1, 2,    Wo+1, Cin)
      w_ref  : (9, Cin, Cout)        tap (kh, kw) stored at index kh*3+kw
      s_ref, b_ref : (1, Cout)       folded BN scale / bias
      o_ref  : (1, TH, Wo, Cout)
    """
    _, TH, Wo, Cout = o_ref.shape
    Cin = xe_ref.shape[3]
    Wo1 = xe_ref.shape[2]

    # Split rows into (output-row, row-parity): element [loc, p] is padded row 2*loc + p.
    xe = xe_ref[0].reshape(TH, 2, Wo1, Cin)
    xo = xo_ref[0].reshape(TH, 2, Wo1, Cin)

    a0, a1 = xe[:, 0], xe[:, 1]          # even cols, kh = 0 / 1
    b0, b1 = xo[:, 0], xo[:, 1]          # odd  cols, kh = 0 / 1

    eh = xe_ref_halo = xeh_ref[0]        # (2, Wo1, Cin); row 0 = padded row 2*TH*(r+1)
    oh = xoh_ref[0]
    if TH > 1:
        a2 = jnp.concatenate([a0[1:], eh[0:1]], axis=0)   # kh = 2 rows (2*loc + 2)
        b2 = jnp.concatenate([b0[1:], oh[0:1]], axis=0)
    else:
        a2 = eh[0:1]
        b2 = oh[0:1]

    a_rows = (a0, a1, a2)                # even columns, kh = 0, 1, 2
    b_rows = (b0, b1, b2)                # odd  columns, kh = 0, 1, 2

    acc = jnp.zeros((TH * Wo, Cout), jnp.float32)
    for kh in range(3):
        for kw in range(3):
            if kw == 0:
                xt = a_rows[kh][:, 0:Wo]        # padded col 2*wo
            elif kw == 1:
                xt = b_rows[kh][:, 0:Wo]        # padded col 2*wo + 1
            else:
                xt = a_rows[kh][:, 1:Wo + 1]    # padded col 2*wo + 2
            acc = acc + jnp.dot(xt.reshape(TH * Wo, Cin),
                                w_ref[kh * 3 + kw],
                                preferred_element_type=jnp.float32)

    y = acc * s_ref[...] + b_ref[...]
    o_ref[0] = jnp.maximum(y, 0.0).reshape(TH, Wo, Cout).astype(o_ref.dtype)


# ---------------------------------------------------------------------------
# Wrapper
# ---------------------------------------------------------------------------
def simple_stem_in(x_nchw, params, *, tile_h=None):
    """x_nchw: (N, Cin, H, W) f32 -> (N, Cout, Ho, Wo) f32 (conv3x3 s2 p1 + BN + ReLU)."""
    w = params["w"]                              # (Cout, Cin, 3, 3)
    gamma, beta, mean, var = params["bn"]
    N, Cin, H, W = x_nchw.shape
    Cout = w.shape[0]

    Ho = (H - 1) // 2 + 1
    Wo = (W - 1) // 2 + 1

    # Output-row tile height: keep per-step VMEM modest; prefer a divisor of Ho.
    if tile_h is None:
        budget = max(1, min(Ho, 1024 // max(Wo, 1)))
        tile_h = 1
        for d in range(1, budget + 1):
            if Ho % d == 0:
                tile_h = d
        if tile_h < max(1, budget // 2):         # prime-ish Ho: accept padded rows
            tile_h = budget
    TH = int(tile_h)
    n_row_tiles = pl.cdiv(Ho, TH)
    Ho_p = n_row_tiles * TH

    # NCHW -> NHWC, zero-pad spatially to exactly (2*Ho_p + 2, 2*Wo + 2).
    x_nhwc = jnp.transpose(x_nchw, (0, 2, 3, 1))
    Hp, Wp = 2 * Ho_p + 2, 2 * Wo + 2
    x_pad = jnp.zeros((N, Hp, Wp, Cin), x_nhwc.dtype)
    x_pad = x_pad.at[:, 1:H + 1, 1:W + 1, :].set(x_nhwc)

    # Stride-2 along W handled as even/odd column phases (layout only, no replication).
    x_we = x_pad[:, :, 0::2, :]                  # (N, Hp, Wo+1, Cin)
    x_wo = x_pad[:, :, 1::2, :]                  # (N, Hp, Wo+1, Cin)
    Wo1 = Wo + 1

    # Weights: (Cout, Cin, 3, 3) -> (9, Cin, Cout), tap (kh, kw) at kh*3+kw.
    w_taps = jnp.transpose(w, (2, 3, 1, 0)).reshape(9, Cin, Cout).astype(jnp.float32)

    # Fold BN (inference / running stats) into per-channel scale & bias.
    inv_std = 1.0 / jnp.sqrt(var.astype(jnp.float32) + EPS)
    scale = (gamma.astype(jnp.float32) * inv_std).reshape(1, Cout)
    bias = (beta.astype(jnp.float32) - mean.astype(jnp.float32) * gamma * inv_std).reshape(1, Cout)

    main_spec = pl.BlockSpec((1, 2 * TH, Wo1, Cin), lambda n, r: (n, r, 0, 0))
    halo_spec = pl.BlockSpec((1, 2, Wo1, Cin), lambda n, r: (n, TH * (r + 1), 0, 0))

    out = pl.pallas_call(
        _stem_conv_bn_relu_kernel,
        out_shape=jax.ShapeDtypeStruct((N, Ho_p, Wo, Cout), jnp.float32),
        grid=(N, n_row_tiles),
        in_specs=[
            main_spec, halo_spec,                # even-column phase (main + halo)
            main_spec, halo_spec,                # odd-column phase  (main + halo)
            pl.BlockSpec((9, Cin, Cout), lambda n, r: (0, 0, 0)),
            pl.BlockSpec((1, Cout), lambda n, r: (0, 0)),
            pl.BlockSpec((1, Cout), lambda n, r: (0, 0)),
        ],
        out_specs=pl.BlockSpec((1, TH, Wo, Cout), lambda n, r: (n, r, 0, 0)),
        compiler_params=pltpu.CompilerParams(
            dimension_semantics=("parallel", "parallel")),
    )(x_we, x_we, x_wo, x_wo, w_taps, scale, bias)

    out = out[:, :Ho]                            # drop rows from Ho -> Ho_p padding
    return jnp.transpose(out, (0, 3, 1, 2))      # NHWC -> NCHW


# ---------------------------------------------------------------------------
# Pure-JAX reference (lax.conv) for verification
# ---------------------------------------------------------------------------
def _ref_forward(x, params):
    w = params["w"]
    gamma, beta, mean, var = params["bn"]
    y = jax.lax.conv_general_dilated(
        x, w, window_strides=(2, 2), padding=[(1, 1), (1, 1)],
        dimension_numbers=("NCHW", "OIHW", "NCHW"))
    y = ((y - mean[None, :, None, None]) / jnp.sqrt(var[None, :, None, None] + EPS)
         * gamma[None, :, None, None] + beta[None, :, None, None])
    return jnp.maximum(y, 0.0)


# ---------------------------------------------------------------------------
if __name__ == "__main__":
    in_w, out_w = 3, 32                          # typical SimpleStemIN widths
    N, H, W = 2, 16, 16

    key = jax.random.PRNGKey(0)
    k_x, k_w, k_g, k_b, k_m, k_v = jax.random.split(key, 6)

    params = {
        "w": 0.2 * jax.random.normal(k_w, (out_w, in_w, 3, 3), jnp.float32),
        "bn": (
            1.0 + 0.1 * jax.random.normal(k_g, (out_w,), jnp.float32),              # gamma
            0.1 * jax.random.normal(k_b, (out_w,), jnp.float32),                     # beta
            0.1 * jax.random.normal(k_m, (out_w,), jnp.float32),                     # running mean
            1.0 + 0.2 * jnp.abs(jax.random.normal(k_v, (out_w,), jnp.float32)),      # running var
        ),
    }
    x = jax.random.normal(k_x, (N, in_w, H, W), jnp.float32)

    # tile_h=4 -> 2 output-row tiles per image: exercises the multi-tile halo path.
    out = jax.block_until_ready(simple_stem_in(x, params, tile_h=4))
    ref = jax.block_until_ready(_ref_forward(x, params))

    assert out.shape == ref.shape, (out.shape, ref.shape)
    err = float(jnp.max(jnp.abs(out - ref)))
    assert jnp.allclose(out, ref, rtol=1e-3, atol=1e-3), err

    print("KERNEL_OK")
</pallas_src>

<mosaic_0001>
module attributes {stable_mosaic.version = 11 : i64} {
  func.func @_stem_conv_bn_relu_kernel(%arg0: i32, %arg1: i32, %arg2: memref<1x8x9x3xf32, #tpu.memory_space<vmem>>, %arg3: memref<1x2x9x3xf32, #tpu.memory_space<vmem>>, %arg4: memref<1x8x9x3xf32, #tpu.memory_space<vmem>>, %arg5: memref<1x2x9x3xf32, #tpu.memory_space<vmem>>, %arg6: memref<9x3x32xf32, #tpu.memory_space<vmem>>, %arg7: memref<1x32xf32, #tpu.memory_space<vmem>>, %arg8: memref<1x32xf32, #tpu.memory_space<vmem>>, %arg9: memref<1x4x8x32xf32, #tpu.memory_space<vmem>>) attributes {dimension_semantics = [#tpu.dimension_semantics<parallel>, #tpu.dimension_semantics<parallel>], iteration_bounds = array<i64: 2, 2>, scalar_prefetch = 0 : i64, scratch_operands = 0 : i64, tpu.core_type = #tpu.core_type<tc>, window_params = [{transform_indices = @transform_0, window_bounds = array<i64: 1, 8, 9, 3>}, {transform_indices = @transform_1, window_bounds = array<i64: 1, 2, 9, 3>}, {transform_indices = @transform_2, window_bounds = array<i64: 1, 8, 9, 3>}, {transform_indices = @transform_3, window_bounds = array<i64: 1, 2, 9, 3>}, {pipeline_mode = #tpu.pipeline_mode<synchronous>, transform_indices = @transform_4, window_bounds = array<i64: 9, 3, 32>}, {pipeline_mode = #tpu.pipeline_mode<synchronous>, transform_indices = @transform_5, window_bounds = array<i64: 1, 32>}, {pipeline_mode = #tpu.pipeline_mode<synchronous>, transform_indices = @transform_6, window_bounds = array<i64: 1, 32>}, {transform_indices = @transform_7, window_bounds = array<i64: 1, 4, 8, 32>}]} {
    %c0 = arith.constant 0 : index
    %c0_0 = arith.constant 0 : index
    %c0_1 = arith.constant 0 : index
    %c0_2 = arith.constant 0 : index
    %0 = vector.load %arg2[%c0, %c0_0, %c0_1, %c0_2] : memref<1x8x9x3xf32, #tpu.memory_space<vmem>>, vector<1x8x9x3xf32>
    %1 = vector.shape_cast %0 : vector<1x8x9x3xf32> to vector<8x9x3xf32>
    %2 = vector.shape_cast %1 : vector<8x9x3xf32> to vector<4x2x9x3xf32>
    %c0_3 = arith.constant 0 : index
    %c0_4 = arith.constant 0 : index
    %c0_5 = arith.constant 0 : index
    %c0_6 = arith.constant 0 : index
    %3 = vector.load %arg4[%c0_3, %c0_4, %c0_5, %c0_6] : memref<1x8x9x3xf32, #tpu.memory_space<vmem>>, vector<1x8x9x3xf32>
    %4 = vector.shape_cast %3 : vector<1x8x9x3xf32> to vector<8x9x3xf32>
    %5 = vector.shape_cast %4 : vector<8x9x3xf32> to vector<4x2x9x3xf32>
    %6 = vector.extract_strided_slice %2 {offsets = [0, 0, 0, 0], sizes = [4, 1, 9, 3], strides = [1, 1, 1, 1]} : vector<4x2x9x3xf32> to vector<4x1x9x3xf32>
    %7 = vector.shape_cast %6 : vector<4x1x9x3xf32> to vector<4x9x3xf32>
    %8 = vector.extract_strided_slice %2 {offsets = [0, 1, 0, 0], sizes = [4, 1, 9, 3], strides = [1, 1, 1, 1]} : vector<4x2x9x3xf32> to vector<4x1x9x3xf32>
    %9 = vector.shape_cast %8 : vector<4x1x9x3xf32> to vector<4x9x3xf32>
    %10 = vector.extract_strided_slice %5 {offsets = [0, 0, 0, 0], sizes = [4, 1, 9, 3], strides = [1, 1, 1, 1]} : vector<4x2x9x3xf32> to vector<4x1x9x3xf32>
    %11 = vector.shape_cast %10 : vector<4x1x9x3xf32> to vector<4x9x3xf32>
    %12 = vector.extract_strided_slice %5 {offsets = [0, 1, 0, 0], sizes = [4, 1, 9, 3], strides = [1, 1, 1, 1]} : vector<4x2x9x3xf32> to vector<4x1x9x3xf32>
    %13 = vector.shape_cast %12 : vector<4x1x9x3xf32> to vector<4x9x3xf32>
    %c0_7 = arith.constant 0 : index
    %c0_8 = arith.constant 0 : index
    %c0_9 = arith.constant 0 : index
    %c0_10 = arith.constant 0 : index
    %14 = vector.load %arg3[%c0_7, %c0_8, %c0_9, %c0_10] : memref<1x2x9x3xf32, #tpu.memory_space<vmem>>, vector<1x2x9x3xf32>
    %15 = vector.shape_cast %14 : vector<1x2x9x3xf32> to vector<2x9x3xf32>
    %c0_11 = arith.constant 0 : index
    %c0_12 = arith.constant 0 : index
    %c0_13 = arith.constant 0 : index
    %c0_14 = arith.constant 0 : index
    %16 = vector.load %arg5[%c0_11, %c0_12, %c0_13, %c0_14] : memref<1x2x9x3xf32, #tpu.memory_space<vmem>>, vector<1x2x9x3xf32>
    %17 = vector.shape_cast %16 : vector<1x2x9x3xf32> to vector<2x9x3xf32>
    %18 = vector.extract_strided_slice %7 {offsets = [1, 0, 0], sizes = [3, 9, 3], strides = [1, 1, 1]} : vector<4x9x3xf32> to vector<3x9x3xf32>
    %19 = vector.extract_strided_slice %15 {offsets = [0, 0, 0], sizes = [1, 9, 3], strides = [1, 1, 1]} : vector<2x9x3xf32> to vector<1x9x3xf32>
    %20 = tpu.concatenate %18, %19 in 0 : vector<3x9x3xf32>, vector<1x9x3xf32> -> vector<4x9x3xf32>
    %21 = vector.extract_strided_slice %11 {offsets = [1, 0, 0], sizes = [3, 9, 3], strides = [1, 1, 1]} : vector<4x9x3xf32> to vector<3x9x3xf32>
    %22 = vector.extract_strided_slice %17 {offsets = [0, 0, 0], sizes = [1, 9, 3], strides = [1, 1, 1]} : vector<2x9x3xf32> to vector<1x9x3xf32>
    %23 = tpu.concatenate %21, %22 in 0 : vector<3x9x3xf32>, vector<1x9x3xf32> -> vector<4x9x3xf32>
    %cst = arith.constant 0.000000e+00 : f32
    %24 = vector.broadcast %cst : f32 to vector<32x32xf32>
    %25 = vector.extract_strided_slice %7 {offsets = [0, 0, 0], sizes = [4, 8, 3], strides = [1, 1, 1]} : vector<4x9x3xf32> to vector<4x8x3xf32>
    %26 = vector.shape_cast %25 : vector<4x8x3xf32> to vector<32x3xf32>
    %c0_15 = arith.constant 0 : index
    %c0_16 = arith.constant 0 : index
    %c0_17 = arith.constant 0 : index
    %27 = vector.load %arg6[%c0_15, %c0_16, %c0_17] : memref<9x3x32xf32, #tpu.memory_space<vmem>>, vector<1x3x32xf32>
    %28 = vector.shape_cast %27 : vector<1x3x32xf32> to vector<3x32xf32>
    %cst_18 = arith.constant dense<0.000000e+00> : vector<32x32xf32>
    %29 = tpu.matmul %26, %28, %cst_18 {dimension_numbers = #tpu.dot_dimension_numbers<[1], [0], [0], [1], [0, 0, 1, 1], [], []>} : vector<32x3xf32>, vector<3x32xf32>, vector<32x32xf32> -> vector<32x32xf32>
    %30 = arith.addf %24, %29 : vector<32x32xf32>
    %31 = vector.extract_strided_slice %11 {offsets = [0, 0, 0], sizes = [4, 8, 3], strides = [1, 1, 1]} : vector<4x9x3xf32> to vector<4x8x3xf32>
    %32 = vector.shape_cast %31 : vector<4x8x3xf32> to vector<32x3xf32>
    %c1 = arith.constant 1 : index
    %c0_19 = arith.constant 0 : index
    %c0_20 = arith.constant 0 : index
    %33 = vector.load %arg6[%c1, %c0_19, %c0_20] : memref<9x3x32xf32, #tpu.memory_space<vmem>>, vector<1x3x32xf32>
    %34 = vector.shape_cast %33 : vector<1x3x32xf32> to vector<3x32xf32>
    %cst_21 = arith.constant dense<0.000000e+00> : vector<32x32xf32>
    %35 = tpu.matmul %32, %34, %cst_21 {dimension_numbers = #tpu.dot_dimension_numbers<[1], [0], [0], [1], [0, 0, 1, 1], [], []>} : vector<32x3xf32>, vector<3x32xf32>, vector<32x32xf32> -> vector<32x32xf32>
    %36 = arith.addf %30, %35 : vector<32x32xf32>
    %37 = vector.extract_strided_slice %7 {offsets = [0, 1, 0], sizes = [4, 8, 3], strides = [1, 1, 1]} : vector<4x9x3xf32> to vector<4x8x3xf32>
    %38 = vector.shape_cast %37 : vector<4x8x3xf32> to vector<32x3xf32>
    %c2 = arith.constant 2 : index
    %c0_22 = arith.constant 0 : index
    %c0_23 = arith.constant 0 : index
    %39 = vector.load %arg6[%c2, %c0_22, %c0_23] : memref<9x3x32xf32, #tpu.memory_space<vmem>>, vector<1x3x32xf32>
    %40 = vector.shape_cast %39 : vector<1x3x32xf32> to vector<3x32xf32>
    %cst_24 = arith.constant dense<0.000000e+00> : vector<32x32xf32>
    %41 = tpu.matmul %38, %40, %cst_24 {dimension_numbers = #tpu.dot_dimension_numbers<[1], [0], [0], [1], [0, 0, 1, 1], [], []>} : vector<32x3xf32>, vector<3x32xf32>, vector<32x32xf32> -> vector<32x32xf32>
    %42 = arith.addf %36, %41 : vector<32x32xf32>
    %43 = vector.extract_strided_slice %9 {offsets = [0, 0, 0], sizes = [4, 8, 3], strides = [1, 1, 1]} : vector<4x9x3xf32> to vector<4x8x3xf32>
    %44 = vector.shape_cast %43 : vector<4x8x3xf32> to vector<32x3xf32>
    %c3 = arith.constant 3 : index
    %c0_25 = arith.constant 0 : index
    %c0_26 = arith.constant 0 : index
    %45 = vector.load %arg6[%c3, %c0_25, %c0_26] : memref<9x3x32xf32, #tpu.memory_space<vmem>>, vector<1x3x32xf32>
    %46 = vector.shape_cast %45 : vector<1x3x32xf32> to vector<3x32xf32>
    %cst_27 = arith.constant dense<0.000000e+00> : vector<32x32xf32>
    %47 = tpu.matmul %44, %46, %cst_27 {dimension_numbers = #tpu.dot_dimension_numbers<[1], [0], [0], [1], [0, 0, 1, 1], [], []>} : vector<32x3xf32>, vector<3x32xf32>, vector<32x32xf32> -> vector<32x32xf32>
    %48 = arith.addf %42, %47 : vector<32x32xf32>
    %49 = vector.extract_strided_slice %13 {offsets = [0, 0, 0], sizes = [4, 8, 3], strides = [1, 1, 1]} : vector<4x9x3xf32> to vector<4x8x3xf32>
    %50 = vector.shape_cast %49 : vector<4x8x3xf32> to vector<32x3xf32>
    %c4 = arith.constant 4 : index
    %c0_28 = arith.constant 0 : index
    %c0_29 = arith.constant 0 : index
    %51 = vector.load %arg6[%c4, %c0_28, %c0_29] : memref<9x3x32xf32, #tpu.memory_space<vmem>>, vector<1x3x32xf32>
    %52 = vector.shape_cast %51 : vector<1x3x32xf32> to vector<3x32xf32>
    %cst_30 = arith.constant dense<0.000000e+00> : vector<32x32xf32>
    %53 = tpu.matmul %50, %52, %cst_30 {dimension_numbers = #tpu.dot_dimension_numbers<[1], [0], [0], [1], [0, 0, 1, 1], [], []>} : vector<32x3xf32>, vector<3x32xf32>, vector<32x32xf32> -> vector<32x32xf32>
    %54 = arith.addf %48, %53 : vector<32x32xf32>
    %55 = vector.extract_strided_slice %9 {offsets = [0, 1, 0], sizes = [4, 8, 3], strides = [1, 1, 1]} : vector<4x9x3xf32> to vector<4x8x3xf32>
    %56 = vector.shape_cast %55 : vector<4x8x3xf32> to vector<32x3xf32>
    %c5 = arith.constant 5 : index
    %c0_31 = arith.constant 0 : index
    %c0_32 = arith.constant 0 : index
    %57 = vector.load %arg6[%c5, %c0_31, %c0_32] : memref<9x3x32xf32, #tpu.memory_space<vmem>>, vector<1x3x32xf32>
    %58 = vector.shape_cast %57 : vector<1x3x32xf32> to vector<3x32xf32>
    %cst_33 = arith.constant dense<0.000000e+00> : vector<32x32xf32>
    %59 = tpu.matmul %56, %58, %cst_33 {dimension_numbers = #tpu.dot_dimension_numbers<[1], [0], [0], [1], [0, 0, 1, 1], [], []>} : vector<32x3xf32>, vector<3x32xf32>, vector<32x32xf32> -> vector<32x32xf32>
    %60 = arith.addf %54, %59 : vector<32x32xf32>
    %61 = vector.extract_strided_slice %20 {offsets = [0, 0, 0], sizes = [4, 8, 3], strides = [1, 1, 1]} : vector<4x9x3xf32> to vector<4x8x3xf32>
    %62 = vector.shape_cast %61 : vector<4x8x3xf32> to vector<32x3xf32>
    %c6 = arith.constant 6 : index
    %c0_34 = arith.constant 0 : index
    %c0_35 = arith.constant 0 : index
    %63 = vector.load %arg6[%c6, %c0_34, %c0_35] : memref<9x3x32xf32, #tpu.memory_space<vmem>>, vector<1x3x32xf32>
    %64 = vector.shape_cast %63 : vector<1x3x32xf32> to vector<3x32xf32>
    %cst_36 = arith.constant dense<0.000000e+00> : vector<32x32xf32>
    %65 = tpu.matmul %62, %64, %cst_36 {dimension_numbers = #tpu.dot_dimension_numbers<[1], [0], [0], [1], [0, 0, 1, 1], [], []>} : vector<32x3xf32>, vector<3x32xf32>, vector<32x32xf32> -> vector<32x32xf32>
    %66 = arith.addf %60, %65 : vector<32x32xf32>
    %67 = vector.extract_strided_slice %23 {offsets = [0, 0, 0], sizes = [4, 8, 3], strides = [1, 1, 1]} : vector<4x9x3xf32> to vector<4x8x3xf32>
    %68 = vector.shape_cast %67 : vector<4x8x3xf32> to vector<32x3xf32>
    %c7 = arith.constant 7 : index
    %c0_37 = arith.constant 0 : index
    %c0_38 = arith.constant 0 : index
    %69 = vector.load %arg6[%c7, %c0_37, %c0_38] : memref<9x3x32xf32, #tpu.memory_space<vmem>>, vector<1x3x32xf32>
    %70 = vector.shape_cast %69 : vector<1x3x32xf32> to vector<3x32xf32>
    %cst_39 = arith.constant dense<0.000000e+00> : vector<32x32xf32>
    %71 = tpu.matmul %68, %70, %cst_39 {dimension_numbers = #tpu.dot_dimension_numbers<[1], [0], [0], [1], [0, 0, 1, 1], [], []>} : vector<32x3xf32>, vector<3x32xf32>, vector<32x32xf32> -> vector<32x32xf32>
    %72 = arith.addf %66, %71 : vector<32x32xf32>
    %73 = vector.extract_strided_slice %20 {offsets = [0, 1, 0], sizes = [4, 8, 3], strides = [1, 1, 1]} : vector<4x9x3xf32> to vector<4x8x3xf32>
    %74 = vector.shape_cast %73 : vector<4x8x3xf32> to vector<32x3xf32>
    %c8 = arith.constant 8 : index
    %c0_40 = arith.constant 0 : index
    %c0_41 = arith.constant 0 : index
    %75 = vector.load %arg6[%c8, %c0_40, %c0_41] : memref<9x3x32xf32, #tpu.memory_space<vmem>>, vector<1x3x32xf32>
    %76 = vector.shape_cast %75 : vector<1x3x32xf32> to vector<3x32xf32>
    %cst_42 = arith.constant dense<0.000000e+00> : vector<32x32xf32>
    %77 = tpu.matmul %74, %76, %cst_42 {dimension_numbers = #tpu.dot_dimension_numbers<[1], [0], [0], [1], [0, 0, 1, 1], [], []>} : vector<32x3xf32>, vector<3x32xf32>, vector<32x32xf32> -> vector<32x32xf32>
    %78 = arith.addf %72, %77 : vector<32x32xf32>
    %c0_43 = arith.constant 0 : index
    %c0_44 = arith.constant 0 : index
    %79 = vector.load %arg7[%c0_43, %c0_44] : memref<1x32xf32, #tpu.memory_space<vmem>>, vector<1x32xf32>
    %80 = vector.broadcast %79 : vector<1x32xf32> to vector<32x32xf32>
    %81 = arith.mulf %78, %80 : vector<32x32xf32>
    %c0_45 = arith.constant 0 : index
    %c0_46 = arith.constant 0 : index
    %82 = vector.load %arg8[%c0_45, %c0_46] : memref<1x32xf32, #tpu.memory_space<vmem>>, vector<1x32xf32>
    %83 = vector.broadcast %82 : vector<1x32xf32> to vector<32x32xf32>
    %84 = arith.addf %81, %83 : vector<32x32xf32>
    %cst_47 = arith.constant 0.000000e+00 : f32
    %85 = vector.broadcast %cst_47 : f32 to vector<32x32xf32>
    %86 = arith.maximumf %84, %85 : vector<32x32xf32>
    %87 = vector.shape_cast %86 : vector<32x32xf32> to vector<4x8x32xf32>
    %c0_48 = arith.constant 0 : index
    %c0_49 = arith.constant 0 : index
    %c0_50 = arith.constant 0 : index
    %c0_51 = arith.constant 0 : index
    %88 = vector.load %arg9[%c0_48, %c0_49, %c0_50, %c0_51] : memref<1x4x8x32xf32, #tpu.memory_space<vmem>>, vector<1x4x8x32xf32>
    %89 = vector.shape_cast %88 : vector<1x4x8x32xf32> to vector<4x8x32xf32>
    %90 = vector.shape_cast %87 : vector<4x8x32xf32> to vector<1x4x8x32xf32>
    tpu.vector_store %arg9[%c0_48, %c0_49, %c0_50, %c0_51], %90 {strides = array<i32>} : memref<1x4x8x32xf32, #tpu.memory_space<vmem>>, vector<1x4x8x32xf32>,
    return
  }
  func.func @transform_0(%arg0: i32, %arg1: i32) -> (i32, i32, i32, i32) {
    %c0_i32 = arith.constant 0 : i32
    %c0_i32_0 = arith.constant 0 : i32
    %c0_i32_1 = arith.constant 0 : i32
    return %arg0, %arg1, %c0_i32, %c0_i32_0 : i32, i32, i32, i32
  }
  func.func @transform_1(%arg0: i32, %arg1: i32) -> (i32, i32, i32, i32) {
    %c1_i32 = arith.constant 1 : i32
    %0 = arith.addi %arg1, %c1_i32 : i32
    %c4_i32 = arith.constant 4 : i32
    %1 = arith.muli %c4_i32, %0 : i32
    %c0_i32 = arith.constant 0 : i32
    %c0_i32_0 = arith.constant 0 : i32
    %c0_i32_1 = arith.constant 0 : i32
    return %arg0, %1, %c0_i32, %c0_i32_0 : i32, i32, i32, i32
  }
  func.func @transform_2(%arg0: i32, %arg1: i32) -> (i32, i32, i32, i32) {
    %c0_i32 = arith.constant 0 : i32
    %c0_i32_0 = arith.constant 0 : i32
    %c0_i32_1 = arith.constant 0 : i32
    return %arg0, %arg1, %c0_i32, %c0_i32_0 : i32, i32, i32, i32
  }
  func.func @transform_3(%arg0: i32, %arg1: i32) -> (i32, i32, i32, i32) {
    %c1_i32 = arith.constant 1 : i32
    %0 = arith.addi %arg1, %c1_i32 : i32
    %c4_i32 = arith.constant 4 : i32
    %1 = arith.muli %c4_i32, %0 : i32
    %c0_i32 = arith.constant 0 : i32
    %c0_i32_0 = arith.constant 0 : i32
    %c0_i32_1 = arith.constant 0 : i32
    return %arg0, %1, %c0_i32, %c0_i32_0 : i32, i32, i32, i32
  }
  func.func @transform_4(%arg0: i32, %arg1: i32) -> (i32, i32, i32) {
    %c0_i32 = arith.constant 0 : i32
    %c0_i32_0 = arith.constant 0 : i32
    %c0_i32_1 = arith.constant 0 : i32
    %c0_i32_2 = arith.constant 0 : i32
    return %c0_i32, %c0_i32_0, %c0_i32_1 : i32, i32, i32
  }
  func.func @transform_5(%arg0: i32, %arg1: i32) -> (i32, i32) {
    %c0_i32 = arith.constant 0 : i32
    %c0_i32_0 = arith.constant 0 : i32
    %c0_i32_1 = arith.constant 0 : i32
    return %c0_i32, %c0_i32_0 : i32, i32
  }
  func.func @transform_6(%arg0: i32, %arg1: i32) -> (i32, i32) {
    %c0_i32 = arith.constant 0 : i32
    %c0_i32_0 = arith.constant 0 : i32
    %c0_i32_1 = arith.constant 0 : i32
    return %c0_i32, %c0_i32_0 : i32, i32
  }
  func.func @transform_7(%arg0: i32, %arg1: i32) -> (i32, i32, i32, i32) {
    %c0_i32 = arith.constant 0 : i32
    %c0_i32_0 = arith.constant 0 : i32
    %c0_i32_1 = arith.constant 0 : i32
    return %arg0, %arg1, %c0_i32, %c0_i32_0 : i32, i32, i32, i32
  }
}

</mosaic_0001>

<bundles_post_ra>
// kernel: tpu_custom_call.1
= control target key start
LH: loop header
LB: loop body
LE: loop exit
PB: predicated region body
PF: predicated region fallthrough
CT: control target
= control target key end

     0   :  { %12 = vsyncpa [#allocation3], 0  ;;  %s2483_s0 = inlined_call_operand.vmem [shape: f32[2,18,9,3], index: 0, kind: input, shape index: {}]   ;;  %s2484_s1 = inlined_call_operand.vmem [shape: f32[2,18,9,3], index: 1, kind: input, shape index: {}]   ;;  %s2485_s2 = inlined_call_operand.vmem [shape: f32[2,18,9,3], index: 2, kind: input, shape index: {}]   ;;  %s2486_s3 = inlined_call_operand.vmem [shape: f32[2,18,9,3], index: 3, kind: input, shape index: {}]   ;;  %s2487_s4 = inlined_call_operand.vmem [shape: f32[9,3,32], index: 4, kind: input, shape index: {}]   ;;  %s2488_s5 = inlined_call_operand.vmem [shape: f32[1,32], index: 5, kind: input, shape index: {}]   ;;  %s2489_s6 = inlined_call_operand.vmem [shape: f32[1,32], index: 6, kind: input, shape index: {}]   ;;  %s2490_s7 = inlined_call_operand.hbm [shape: f32[2,8,8,32], index: 7, kind: output, shape index: {}]  }
   0x1   :  { %14 = vsyncpa [#allocation3 + $0x1], 0  ;;  %s2143_s24 = smov 0   ;;  %s2145_s25 = smov 0  }
   0x2   :  { %s2147_s26 = smov 0   ;;  %s2149_s27 = smov 0  }
   0x3   :  { %s2151_s28 = smov 0   ;;  %s2153_s29 = smov 0  }
   0x4   :  { %s2155_s30 = smov 0   ;;  %s2157_s8 = smov 0  }
   0x5 LB: > { %2495 = sst [smem:[#allocation5_spill]] %s2090_s29  ;;  %s1676_s9 = sadd.s32 4294967295, %s2098_s8   ;;  %s2098_s8 = sphi %s2157_s8, %s20_s8   ;;  %s2094_s30 = sphi %s2155_s30, %s2505_s30   ;;  %s2090_s29 = sphi %s2153_s29, %s2504_s29   ;;  %s2086_s28 = sphi %s2151_s28, %s2503_s28   ;;  %s2082_s27 = sphi %s2149_s27, %s2502_s27   ;;  %s2078_s26 = sphi %s2147_s26, %s2508_s26   ;;  %s2074_s25 = sphi %s2145_s25, %s2507_s25   ;;  %s2070_s24 = sphi %s2143_s24, %s2506_s24  }
   0x6   : > { %2496 = sst [smem:[#allocation6_spill]] %s2094_s30  ;;  %s1677_s10 = sadd.s32 4294967294, %s2098_s8  }
   0x7   : > { %s29_s11 = sadd.s32 1, %s2090_s29  ;;  %s32_s12 = sadd.s32 1, %s2094_s30 }
   0x8   : > { %p30_p0 = scmp.ge.s32.totalorder %s29_s11, 2  ;;  %p234_p1 = scmp.ne.s32.totalorder %s2078_s26, %s2074_s25 }
   0x9   : > { %p235_p2 = scmp.eq.s32.totalorder %s1676_s9, 3  ;;  %p240_p5 = scmp.ne.s32.totalorder %s2074_s25, %s2070_s24 }
   0xa   : > { %s2510_s11 = smov (%p30_p0, %s29_s11), 0  ;;  %s2512_s12 = smov (!%p30_p0, %s32_s12), %s2094_s30 }
   0xb   : > { %2497 = sst [smem:[#allocation7_spill]] %s2510_s11  ;;  %s220_s13 = ssub.s32 %s2090_s29, %s2510_s11 }
   0xc   : > { %p2194_p3 = por %p235_p2, %p234_p1  ;;  %p34_p4 = scmp.ge.s32.totalorder %s2512_s12, 2 }
   0xd   : > { %p241_p6 = scmp.eq.s32.totalorder %s1677_s10, 3  ;;  %p1684_p7 = scmp.ge.s32.totalorder %s2098_s8, 1 }
   0xe   : > { %s2514_s12 = smov (%p34_p4, %s2512_s12), 0  ;;  %p352_p9 = scmp.lt.s32.totalorder %s2098_s8, 5 }
   0xf   : > { %2499 = sst [smem:[#allocation8_spill]] %s2514_s12  ;;  %p2203_p8 = por %p241_p6, %p240_p5 }
  0x10   : > { %s219_s16 = ssub.s32 %s2094_s30, %s2514_s12  ;;  %s224_s17 = sadd.s32 1, %s2078_s26 }
  0x11   : > { %s221_s18 = sor.u32 %s220_s13, %s219_s16  ;;  %p353_p10 = pnand %p1684_p7, %p352_p9 }
  0x12   : > { %p222_p11 = scmp.eq.s32.totalorder %s221_s18, 0  ;;  %v1700_v0 = vld [vmem:[%s2487_s4 + $0x4] sm:$0x7] (!%p353_p10)  ;;  %vm549_vm0 = vcmask (!%p353_p10), 1042432   ;;  %v2220_v1 = vld [vmem:[%s2487_s4 + $0x10] sm:$0x7] (!%p353_p10) }
  0x13   : > { %356 = sbr.rel (%p353_p10) target bundleno = 307 (0x133), region = 48  ;;  %s2223_s9 = sshll.u32 (!%p353_p10), %s2082_s27, 3  ;;  %1824 = vmatprep.subr.msk.mxu1 (!%p353_p10), %vm549_vm0, %v1700_v0  ;;  %1856 = vmatprep.subr.msk.mxu0 (!%p353_p10), %vm549_vm0, %v2220_v1  ;;  %v533_v2 = vld [vmem:[%s2487_s4] sm:$0x7] (!%p353_p10)  ;;  %v1729_v3 = vld [vmem:[%s2487_s4 + $0x14] sm:$0x7] (!%p353_p10) }
  0x14   : > { %s2212_s19 = scalar_select %p222_p11, %s2078_s26, %s224_s17  }
  0x15   : > { %p439_p12 = scmp.lt.s32.totalorder (!%p353_p10), %s2086_s28, 1  ;;  %p441_p13 = scmp.lt.s32.totalorder (!%p353_p10), %s2223_s9, 17  ;;  %1825 = vmatpush3.msk.msra.mxu1 (!%p353_p10), %vm549_vm0, %v1700_v0  ;;  %1857 = vmatpush3.msk.msra.mxu0 (!%p353_p10), %vm549_vm0, %v2220_v1  ;;  %vm536_vm1 = vcmask (!%p353_p10), 23552   ;;  %v1711_v9 = vld [vmem:[%s2487_s4 + $0x8] sm:$0x7] (!%p353_p10)  ;;  %vm742_vm2 = vcmask (!%p353_p10), 1046528  }
  0x16   : > { %1832 = vmatprep.subr.msk.mxu1 (!%p353_p10), %vm549_vm0, %v533_v2  ;;  %1864 = vmatprep.subr.msk.mxu0 (!%p353_p10), %vm549_vm0, %v1729_v3  ;;  %s1776_s22 = sadd.s32 (!%p353_p10), 8, %s2223_s9  ;;  %v1735_v12 = vld [vmem:[%s2487_s4 + $0x18] sm:$0x7] (!%p353_p10)  ;;  %v1717_v38 = vld [vmem:[%s2487_s4 + $0xc] sm:$0x7] (!%p353_p10)  ;;  %vm1507_vm3 = vcmask (!%p353_p10), 261120  }
  0x17   : > { %p2249_p0 = scmp.lt.s32.totalorder (!%p353_p10), %s1776_s22, 17  ;;  %v1741_v39 = vld [vmem:[%s2487_s4 + $0x1c] sm:$0x7] (!%p353_p10)  ;;  %v1747_v53 = vld [vmem:[%s2487_s4 + $0x20] sm:$0x7] (!%p353_p10)  ;;  %s2100_s17 = smov (!%p353_p10), [#allocation2]  }
  0x1a   : > { %s2240_s18 = scalar_select %p439_p12, %s2086_s28, 1 }
  0x1b   : > { %s442_s20 = scalar_select %p441_p13, %s2223_s9, 17 }
  0x1c   : > { %s1930_s21 = smul.u32 36, %s2240_s18  ;;  %s2516_s22 = smov (!%p2249_p0, %s1776_s22), 17 }
  0x1d   : > { %s1687_s23 = sshll.u32 %s442_s20, 1  ;;  %s1691_s12 = sshll.u32 %s2516_s22, 1 }
  0x1e   : > { %s445_s10 = sadd.s32 %s1930_s21, %s1687_s23  ;;  %s2340_s22 = sadd.s32 %s1930_s21, %s1691_s12 }
  0x1f   : > { %s1688_s13 = sshll.u32 %s445_s10, 3  ;;  %s1692_s18 = sshll.u32 %s2340_s22, 3 }
  0x20   : > { %s2256_s11 = scalar_lea.vmem %s2483_s0, %s1688_s13  ;;  %s2261_s9 = scalar_lea.vmem %s2485_s2, %s1688_s13 }
  0x21   : > { %v522_v4 = vld [vmem:[%s2261_s9] sm:$0xff]  ;;  %v523_v5 = vld [vmem:[%s2261_s9 + $0x10] sm:$0xff]  ;;  %v509_v11 = vld [vmem:[%s2256_s11 + $0x18] sm:$0x1]  ;;  %s465_s29 = scalar_lea.vmem %s2484_s1, %s1692_s18  ;;  %s501_s10 = scalar_lea.vmem %s2486_s3, %s1692_s18 }
  0x22   : > { %v2266_v6 = vld [vmem:[%s2261_s9 + $0x20] sm:$0xff]  ;;  %1826 = vmatprep.mubr.msk.f32.mxu1 %vm536_vm1, %v522_v4  ;;  %1858 = vmatprep.mubr.msk.f32.mxu0 %vm536_vm1, %v523_v5  ;;  %v525_v7 = vld [vmem:[%s2261_s9 + $0x30] sm:$0xff]  ;;  %v1074_v15 = vrot.slane %v509_v11, 1  ;;  %v513_v18 = vld [vmem:[%s2256_s11 + $0x38] sm:$0x1]  ;;  %s430_s13 = sand.u32 1, %s2074_s25  }
  0x23   : > { %v2272_v8 = vld [vmem:[%s2261_s9 + $0x40] sm:$0xff]  ;;  %1827 = vmatmul.mubr.msk.f32.vlgmr.msra.gmra.mrb[0].mxu1 %vm536_vm1, %v2266_v6  ;;  %1859 = vmatmul.mubr.msk.f32.vlgmr.msra.gmra.mrb[0].mxu0 %vm536_vm1, %v525_v7  ;;  %v2281_v10 = vld [vmem:[%s2256_s11 + $0x10] sm:$0xff]  ;;  %v1077_v22 = vrot.slane %v513_v18, 1  ;;  %v517_v23 = vld [vmem:[%s2256_s11 + $0x58] sm:$0x1]  ;;  %s1685_s21 = sshll.u32 %s430_s13, 5 }
  0x24   : > { %1833 = vmatpush3.msk.msra.mxu1 %vm549_vm0, %v533_v2  ;;  %1865 = vmatpush3.msk.msra.mxu0 %vm549_vm0, %v1729_v3  ;;  %v2290_v13 = vld [vmem:[%s2261_s9 + $0x60] sm:$0xff]  ;;  %v1073_v14 = vrot.slane %v2281_v10, 1  ;;  %v2294_v16 = vld [vmem:[%s2256_s11 + $0x30] sm:$0xff]  ;;  %v1080_v26 = vrot.slane %v517_v23, 1  ;;  %v521_v27 = vld [vmem:[%s2256_s11 + $0x78] sm:$0x1] }
  0x25   : > { %1829 = vmatprep.mubr.msk.f32.mxu1 %vm536_vm1, %v2272_v8  ;;  %v506_v17 = vld [vmem:[%s2256_s11] sm:$0xff]  ;;  %1840 = vmatprep.subr.msk.mxu1 %vm549_vm0, %v1711_v9  ;;  %v1076_v19 = vrot.slane %v2294_v16, 1  ;;  %v2307_v20 = vld [vmem:[%s2256_s11 + $0x50] sm:$0xff]  ;;  %v1083_v31 = vrot.slane %v521_v27, 1  ;;  %v507_v32 = vld [vmem:[%s2256_s11 + $0x8] sm:$0x1] }
  0x26   : > { %v1075_v21 = vsel %vm742_vm2, %v1073_v14, %v1074_v15  ;;  %1872 = vmatprep.subr.msk.mxu0 %vm549_vm0, %v1735_v12  ;;  %v1079_v24 = vrot.slane %v2307_v20, 1  ;;  %v2314_v25 = vld [vmem:[%s2256_s11 + $0x70] sm:$0xff]  ;;  %v510_v28 = vld [vmem:[%s2256_s11 + $0x20] sm:$0xff]  ;;  %v743_v33 = vrot.slane %v506_v17, 1  ;;  %v744_v34 = vrot.slane %v507_v32, 1  ;;  %s2008_s22 = sshll.u32 %s2100_s17, 4  ;;  %s2009_s22 = int_to_ptr.vmem [resolvable:$false] %s2008_s22 }
  0x27   : > { %1830 = vmatmul.mubr.msk.f32.gmra.mrb[2].mxu1 %vm536_vm1, %v2290_v13  ;;  %1866 = vmatprep.mubr.msk.f32.mxu0 %vm536_vm1, %v1075_v21  ;;  %v1078_v29 = vsel %vm742_vm2, %v1076_v19, %v1077_v22  ;;  %v1082_v30 = vrot.slane %v2314_v25, 1  ;;  %v511_v35 = vld [vmem:[%s2256_s11 + $0x28] sm:$0x1]  ;;  %v514_v36 = vld [vmem:[%s2256_s11 + $0x40] sm:$0xff]  ;;  %v746_v41 = vrot.slane %v510_v28, 1  ;;  %v527_v58 = vld [vmem:[%s2261_s9 + $0x50] sm:$0xff] }
  0x28   : > { %1834 = vmatprep.mubr.msk.f32.mxu1 %vm536_vm1, %v506_v17  ;;  %v1081_v37 = vsel %vm742_vm2, %v1079_v24, %v1080_v26  ;;  %v515_v40 = vld [vmem:[%s2256_s11 + $0x48] sm:$0x1]  ;;  %v518_v42 = vld [vmem:[%s2256_s11 + $0x60] sm:$0xff]  ;;  %v747_v44 = vrot.slane %v511_v35, 1  ;;  %v745_v45 = vsel %vm742_vm2, %v743_v33, %v744_v34  ;;  %v749_v47 = vrot.slane %v514_v36, 1  ;;  %v529_v61 = vld [vmem:[%s2261_s9 + $0x70] sm:$0xff] }
  0x29   : > { %v1084_v43 = vsel %vm742_vm2, %v1082_v30, %v1083_v31  ;;  %v519_v46 = vld [vmem:[%s2256_s11 + $0x68] sm:$0x1]  ;;  %v750_v48 = vrot.slane %v515_v40, 1  ;;  %v752_v49 = vrot.slane %v518_v42, 1  ;;  %v530_v55 = vld [vmem:[%s465_s29] sm:$0xff]  ;;  %s1756_s9 = sshll.u32 %s2082_s27, 2 }
  0x2a   : > { %v748_v50 = vsel %vm742_vm2, %v746_v41, %v747_v44  ;;  %v753_v51 = vrot.slane %v519_v46, 1  ;;  %v532_v56 = vld [vmem:[%s501_s10] sm:$0xff]  ;;  %v531_v57 = vld [vmem:[%s465_s29 + $0x8] sm:$0x1]  ;;  %v1382_v59 = vrot.slane %v530_v55, 1  ;;  %s1757_s11 = sshll.u32 %s2086_s28, 3 }
  0x2b   : > { %1835 = vmatmul.mubr.msk.f32.vlgmr.msra.gmra.mrb[0].mxu1 %vm536_vm1, %v510_v28  ;;  %1867 = vmatmul.mubr.msk.f32.vlgmr.msra.gmra.mrb[0].mxu0 %vm536_vm1, %v1078_v29  ;;  %v751_v52 = vsel %vm742_vm2, %v749_v47, %v750_v48  ;;  %v1383_v60 = vrot.slane %v531_v57, 1  ;;  %v1753_v2 = vld [vmem:[%s2488_s5] ss:$0 sm:$0xff]  ;;  %s1525_s29 = sadd.s32 %s1757_s11, %s1756_s9  ;;  %s432_s28 = scalar_lea.vmem [#allocation2], %s1685_s21 }
  0x2c   : > { %1841 = vmatpush3.msk.msra.mxu1 %vm549_vm0, %v1711_v9  ;;  %1873 = vmatpush3.msk.msra.mxu0 %vm549_vm0, %v1735_v12  ;;  %v754_v54 = vsel %vm742_vm2, %v752_v49, %v753_v51  ;;  %v1754_v5 = vld [vmem:[%s2489_s6] ss:$0 sm:$0xff]  ;;  %s1758_s27 = sshll.u32 %s1525_s29, 7  ;;  %s1528_s30 = sshll.u32 %s432_s28, 4  ;;  %s2425_s30 = int_to_ptr.vmem [resolvable:$true] %s1528_s30 }
  0x2d   : > { %1837 = vmatprep.mubr.msk.f32.mxu1 %vm536_vm1, %v514_v36  ;;  %1869 = vmatprep.mubr.msk.f32.mxu0 %vm536_vm1, %v1081_v37  ;;  %v1384_v62 = vsel %vm742_vm2, %v1382_v59, %v1383_v60  ;;  %s2423_s12 = scalar_lea.hbm %s2490_s7, %s1758_s27  ;;  %s2431_s10 = scalar_lea.sflag [#allocation3], %s430_s13 }
  0x2e   : > { %1848 = vmatprep.subr.msk.mxu1 %vm549_vm0, %v1717_v38  ;;  %1880 = vmatprep.subr.msk.mxu0 %vm549_vm0, %v1741_v39  ;;  %s2004_s16 = scalar_lea.vmem %s2425_s30, 512  ;;  %s2010_s18 = scalar_lea.vmem %s2009_s22, 1024 }
  0x2f   : > { %1838 = vmatmul.mubr.msk.f32.gmra.mrb[2].mxu1 %vm536_vm1, %v518_v42  ;;  %1870 = vmatmul.mubr.msk.f32.gmra.mrb[2].mxu0 %vm536_vm1, %v1084_v43  ;;  %p2005_p1 = scmp.ne.s32.totalorder %s2425_s30, %s2004_s16  ;;  %p2011_p5 = scmp.lt.s32.totalorder %s2425_s30, %s2009_s22 }
  0x30   : > { %1842 = vmatprep.mubr.msk.f32.mxu1 %vm536_vm1, %v745_v45  ;;  %1874 = vmatprep.mubr.msk.f32.mxu0 %vm536_vm1, %v510_v28  ;;  %p2012_p6 = scmp.lt.s32.totalorder %s2010_s18, %s2004_s16 }
  0x31   : > { %p2006_p2 = pnand %p2005_p1, %p2194_p3 }
  0x32   : > { %p2013_p7 = por %p2012_p6, %p2011_p5 }
  0x33   : > { %1843 = vmatmul.mubr.msk.f32.vlgmr.msra.gmra.mrb[0].mxu1 %vm536_vm1, %v748_v50  ;;  %1875 = vmatmul.mubr.msk.f32.vlgmr.msra.gmra.mrb[0].mxu0 %vm536_vm1, %v514_v36  ;;  %p2007_p4 = pneg %p2006_p2 }
  0x34   : > { %1849 = vmatpush3.msk.msra.mxu1 %vm549_vm0, %v1717_v38  ;;  %1881 = vmatpush3.msk.msra.mxu0 %vm549_vm0, %v1741_v39 }
  0x35   : > { %1845 = vmatprep.mubr.msk.f32.mxu1 %vm536_vm1, %v751_v52  ;;  %1877 = vmatprep.mubr.msk.f32.mxu0 %vm536_vm1, %v518_v42  ;;  %p2014_p9 = pnand %p2013_p7, %p2007_p4 }
  0x36   : > { %1896 = vmatprep.subr.msk.mxu1 %vm549_vm0, %v2220_v1  ;;  %1888 = vmatprep.subr.msk.mxu0 %vm549_vm0, %v1747_v53 }
  0x37   : > { %1846 = vmatmul.mubr.msk.f32.gmra.mrb[2].mxu1 %vm536_vm1, %v754_v54  ;;  %1878 = vmatmul.mubr.msk.f32.gmra.mrb[2].mxu0 %vm536_vm1, %v530_v55 }
  0x38   : > { %1850 = vmatprep.mubr.msk.f32.mxu1 %vm536_vm1, %v2281_v10  ;;  %1882 = vmatprep.mubr.msk.f32.mxu0 %vm536_vm1, %v2266_v6 }
  0x3b   : > { %1851 = vmatmul.mubr.msk.f32.vlgmr.msra.gmra.mrb[0].mxu1 %vm536_vm1, %v2294_v16  ;;  %1883 = vmatmul.mubr.msk.f32.vlgmr.msra.gmra.mrb[0].mxu0 %vm536_vm1, %v2272_v8 }
  0x3c   : > { %1897 = vmatpush3.msk.msra.mxu1 %vm549_vm0, %v2220_v1  ;;  %1889 = vmatpush3.msk.msra.mxu0 %vm549_vm0, %v1747_v53 }
  0x3d   : > { %1853 = vmatprep.mubr.msk.f32.mxu1 %vm536_vm1, %v2307_v20  ;;  %1885 = vmatprep.mubr.msk.f32.mxu0 %vm536_vm1, %v2290_v13 }
  0x3f   : > { %1854 = vmatmul.mubr.msk.f32.gmra.mrb[2].mxu1 %vm536_vm1, %v2314_v25  ;;  %1886 = vmatmul.mubr.msk.f32.gmra.mrb[2].mxu0 %vm536_vm1, %v532_v56 }
  0x40   : > { %1890 = vmatprep.mubr.msk.f32.mxu0 %vm536_vm1, %v748_v50  ;;  %1861 = vmatprep.mubr.msk.f32.mxu1 %vm536_vm1, %v527_v58 }
  0x43   : > { %1891 = vmatmul.mubr.msk.f32.vlgmr.msra.gmra.mrb[0].mxu0 %vm536_vm1, %v751_v52 }
  0x44   : > { %1893 = vmatprep.mubr.msk.f32.mxu0 %vm536_vm1, %v754_v54 }
  0x47   : > { %1862 = vmatmul.mubr.msk.f32.vlgmr.msra.gmra.mrb[2].mxu1 %vm536_vm1, %v529_v61  ;;  %1894 = vmatmul.mubr.msk.f32.gmra.mrb[2].mxu0 %vm536_vm1, %v1384_v62 }
 0x10e   : > { %v1852_v63 = vpop.f32.mrb[0].mxu1 }
 0x10f   : > { %v940_v0 = vpop.f32.mrb[1].mxu1 }
 0x116   : > { %v1892_v1 = vpop.f32.mrb[0].mxu0 }
 0x117   : > { %v1898_v3 = vadd.f32 %v1892_v1, %v1852_v63  ;;  %v1458_v4 = vpop.f32.mrb[1].mxu0 }
 0x118   : > { %v1899_v6 = vadd.f32 %v1458_v4, %v940_v0 }
 0x119   : > { %v1489_v7 = vmul.f32 %v1898_v3, %v1753_v2 }
 0x11a   : > { %v1488_v8 = vmul.f32 %v1899_v6, %v1753_v2  ;;  %v1863_v9 = vpop.f32.mrb[2].mxu1  ;;  %v1895_v10 = vpop.f32.mrb[2].mxu0 }
 0x11b   : > { %v1500_v11 = vadd.f32 %v1754_v5, %v1489_v7  ;;  %v1900_v12 = vadd.f32 %v1895_v10, %v1863_v9  ;;  %v1056_v13 = vpop.f32.mrb[3].mxu1  ;;  %v1468_v14 = vpop.f32.mrb[3].mxu0 }
 0x11c   : > { %v1499_v15 = vadd.f32 %v1754_v5, %v1488_v8  ;;  %v1901_v16 = vadd.f32 %v1468_v14, %v1056_v13 }
 0x11d   : > { %v1504_v17 = vmax.f32 %v1500_v11, 0.0  ;;  %v1491_v18 = vmul.f32 %v1900_v12, %v1753_v2 }
 0x11e   : > { %v1503_v19 = vmax.f32 %v1499_v15, 0.0  ;;  %v1490_v20 = vmul.f32 %v1901_v16, %v1753_v2 }
 0x11f   : > { %1509 = vst.msk [vmem:[%s432_s28 + $0x8] sm:$0xff] %vm1507_vm3, %v1504_v17  ;;  %v1502_v21 = vadd.f32 %v1754_v5, %v1491_v18 }
 0x120   : > { %1508 = vst.msk [vmem:[%s432_s28] sm:$0xff] %vm1507_vm3, %v1503_v19  ;;  %v1501_v22 = vadd.f32 %v1754_v5, %v1490_v20 }
 0x121   : > { %v1506_v23 = vmax.f32 %v1502_v21, 0.0 }
 0x122   : > { %v1505_v24 = vmax.f32 %v1501_v22, 0.0 }
 0x123   : > { %1511 = vst.msk [vmem:[%s432_s28 + $0x18] sm:$0xff] %vm1507_vm3, %v1506_v23 }
 0x124   : > { %1510 = vst.msk [vmem:[%s432_s28 + $0x10] sm:$0xff] %vm1507_vm3, %v1505_v24 }
 0x125   : > { %2017 = shalt.err (!%p2014_p9)
}
 0x126   : > { %s2018_s13 = scalar_lea.hbm %s2423_s12, 512  ;;  %s2022_s21 = scalar_lea.hbm %s2490_s7, 2048 }
 0x127   : > { %p2019_p10 = scmp.ne.s32.totalorder %s2423_s12, %s2018_s13  ;;  %p2023_p13 = scmp.lt.u32.totalorder %s2423_s12, %s2490_s7 }
 0x128   : > { %p2024_p0 = scmp.lt.u32.totalorder %s2022_s21, %s2018_s13  ;;  %p2026_p2 = scmp.lt.u32.totalorder %s2018_s13, %s2423_s12 }
 0x129   : > { %p2020_p11 = pnand %p2019_p10, %p2194_p3 }
 0x12a   : > { %p2025_p1 = por %p2024_p0, %p2023_p13 }
 0x12b   : > { %p2021_p12 = pneg %p2020_p11 }
 0x12c   : > { %p2027_p4 = por %p2026_p2, %p2025_p1 }
 0x12e   : > { %p2028_p5 = pnand %p2027_p4, %p2021_p12 }
 0x130   : > { %2031 = shalt.err (!%p2028_p5)
}
 0x131   : > { %s2101_s28 = smov 128   ;;  %s2102_s20 = smov 8  }
 0x132   : > { %1931 = dma.vmem_to_hbm [thread:$0]  (%p2194_p3), %s2425_s30, 512, %s2423_s12, %s2431_s10, %s2101_s28, %s2101_s28, %s2102_s20  }
 0x133 PF: > { %p1937_p6 = scmp.ge.s32.totalorder %s2098_s8, 2  ;;  %s1543_s23 = sand.u32 1, %s2070_s24  }
 0x134   : > { %s1544_s16 = scalar_lea.sflag [#allocation3], %s1543_s23 }
 0x135   : > { %p1934_p7 = pnand %p1937_p6, %p2203_p8 }
 0x137   : > { %2065 = dma.done.wait (!%p1934_p7), %s1544_s16, 512  }
 0x138   : > { %2067 = vsyncadd (!%p1934_p7), %s1544_s16, 4294966784  ;;  %s20_s8 = sadd.s32 1, %s2098_s8   ;;  %s2502_s27 = sld [smem:[#allocation5_spill]] }
 0x139   : > { %p17_p9 = scmp.ge.s32.totalorder %s20_s8, 6   ;;  %s2503_s28 = sld [smem:[#allocation6_spill]] }
 0x13a   : > { %s2504_s29 = sld [smem:[#allocation7_spill]]  ;;  %s2505_s30 = sld [smem:[#allocation8_spill]] }
 0x13b   : > { %s2506_s24 = smov %s2074_s25  ;;  %s2507_s25 = smov %s2078_s26 }
 0x13c   : > { %s2508_s26 = smov %s2212_s19  ;;  %19 = sbr.rel (!%p17_p9) target bundleno = 5 (0x5), region = 100 }
 0x143   :  { %1549 = vsyncpa [#allocation3], 1 }
 0x144   :  { %1551 = vsyncpa [#allocation3 + $0x1], 1 }

</bundles_post_ra>
